<compile_context>
chip_gen: v6e
topology: v6e:2x2x1
jax: 0.10.0
libtpu: 0.0.40
codegen_flags: <defaults>
</compile_context>

<pallas_src>
import functools

import jax
import jax.numpy as jnp
from jax.experimental import pallas as pl
from jax.experimental.pallas import tpu as pltpu

IN_DIM = 768
HID_DIM = 64
OUT_DIM = 2


def _cdiv(a, b):
    return -(-a // b)


def _round_up(n, m):
    return _cdiv(n, m) * m


def _distil_kernel(x_ref, w1_ref, b1_ref, w2_ref, b2_ref, o_ref, *, mxu_dtype):
    # x_ref: (tm, 768) f32 tile of the batch; w1/w2 arrive already in mxu_dtype.
    x = x_ref[...].astype(mxu_dtype)
    # linear_sentence: (tm, 768) @ (768, 64), f32 accumulation, f32 bias.
    h = jnp.dot(x, w1_ref[...], preferred_element_type=jnp.float32) + b1_ref[...]
    # relu (f32, VPU)
    h = jnp.maximum(h, 0.0)
    # dropout (eval/inference mode) = identity
    # linear_end: (tm, 64) @ (64, 2), f32 accumulation, f32 bias.
    out = jnp.dot(h.astype(mxu_dtype), w2_ref[...],
                  preferred_element_type=jnp.float32) + b2_ref[...]
    o_ref[...] = out.astype(o_ref.dtype)


def _choose_tile(batch, tm):
    """Balanced batch tile (multiple of 8), with a >=2-step grid for v7x megacore."""
    tm = max(8, min(_round_up(tm, 8), _round_up(batch, 8)))
    n_tiles = _cdiv(batch, tm)
    # v7x has 2 TensorCores; a single grid step would leave one idle.  Split batches that are
    # large enough (>= 2 * ~512-row floor) into at least two tiles.
    if n_tiles == 1 and batch >= 1024:
        n_tiles = 2
    return _round_up(_cdiv(batch, n_tiles), 8)


@functools.partial(jax.jit, static_argnames=("tm", "use_bf16"))
def distil_model(x, w1, b1, w2, b2, *, tm=2048, use_bf16=True):
    """x: (B, 768) f32.  w1: (768, 64), b1: (1, 64), w2: (64, 2), b2: (1, 2)  (all f32).

    Weights are stored pre-transposed as (in, out) so the kernel computes x @ W + b.
    """
    batch = x.shape[0]
    mxu_dtype = jnp.bfloat16 if use_bf16 else jnp.float32

    # Tiny one-off casts (<0.2 MiB); x itself stays f32 in HBM and is cast per-tile in VMEM,
    # which avoids an extra full HBM read+write pass over the activations.
    w1 = w1.astype(mxu_dtype)
    w2 = w2.astype(mxu_dtype)

    tm_eff = _choose_tile(batch, tm)
    grid = (_cdiv(batch, tm_eff),)

    cost = pl.CostEstimate(
        flops=2 * batch * IN_DIM * HID_DIM + 2 * batch * HID_DIM * OUT_DIM,
        transcendentals=0,
        bytes_accessed=(batch * IN_DIM * x.dtype.itemsize
                        + batch * OUT_DIM * x.dtype.itemsize
                        + IN_DIM * HID_DIM * w1.dtype.itemsize
                        + HID_DIM * OUT_DIM * w2.dtype.itemsize
                        + HID_DIM * 4 + OUT_DIM * 4),
    )

    return pl.pallas_call(
        functools.partial(_distil_kernel, mxu_dtype=mxu_dtype),
        out_shape=jax.ShapeDtypeStruct((batch, OUT_DIM), x.dtype),
        grid_spec=pltpu.PrefetchScalarGridSpec(
            num_scalar_prefetch=0,
            grid=grid,
            in_specs=[
                # Large batch tile: the only block index that changes across the grid.
                # Ragged B is handled by Pallas' partial-last-block masking (rows are
                # independent), so no wrapper-side jnp.pad copy is needed.
                pl.BlockSpec((tm_eff, IN_DIM), lambda i: (i, 0)),
                # Constant index_maps -> weights/biases stay resident in VMEM.
                pl.BlockSpec((IN_DIM, HID_DIM), lambda i: (0, 0)),
                pl.BlockSpec((1, HID_DIM), lambda i: (0, 0)),
                pl.BlockSpec((HID_DIM, OUT_DIM), lambda i: (0, 0)),
                pl.BlockSpec((1, OUT_DIM), lambda i: (0, 0)),
            ],
            # (tm, 2) output: total writeback is only B*8 bytes; do NOT pad OUT_DIM to 128.
            out_specs=pl.BlockSpec((tm_eff, OUT_DIM), lambda i: (i, 0)),
        ),
        compiler_params=pltpu.CompilerParams(
            # Batch axis is embarrassingly parallel -> megacore sharding on v7x.
            dimension_semantics=("parallel",),
            # Covers the double-buffered f32 x tile at tm=2048 (~12.6 MiB) plus weights, with
            # headroom on every generation (v5e/v6e 128 MiB physical, v7x 64 MiB per TC).
            vmem_limit_bytes=32 * 1024 * 1024,
        ),
        cost_estimate=cost,
    )(x, w1, b1, w2, b2)


def init_params(key):
    """Deterministic init mimicking nn.Linear default (uniform +/- 1/sqrt(fan_in))."""
    k1, k2, k3, k4 = jax.random.split(key, 4)
    bound1 = 1.0 / jnp.sqrt(IN_DIM)
    bound2 = 1.0 / jnp.sqrt(HID_DIM)
    # Stored as (in, out): transpose of PyTorch's (out, in) weight layout.
    w1 = jax.random.uniform(k1, (IN_DIM, HID_DIM), jnp.float32, -bound1, bound1)
    b1 = jax.random.uniform(k2, (1, HID_DIM), jnp.float32, -bound1, bound1)
    w2 = jax.random.uniform(k3, (HID_DIM, OUT_DIM), jnp.float32, -bound2, bound2)
    b2 = jax.random.uniform(k4, (1, OUT_DIM), jnp.float32, -bound2, bound2)
    return w1, b1, w2, b2


if __name__ == "__main__":
    key = jax.random.PRNGKey(0)
    kx, kx2, kx3, kp = jax.random.split(key, 4)

    w1, b1, w2, b2 = init_params(kp)

    def ref_fn(xv):  # f32 reference matching the PyTorch module (eval-mode dropout).
        return jnp.maximum(xv @ w1 + b1, 0.0) @ w2 + b2

    # bf16 MXU inputs with f32 accumulation -> ~1e-3 relative error vs the f32 reference.
    TOL = dict(atol=3e-2, rtol=3e-2)

    # Small aligned batch; "input_ids" here are 768-d sentence features as the module implies.
    B = 8
    x = jax.random.normal(kx, (B, IN_DIM), jnp.float32)
    out = jax.block_until_ready(distil_model(x, w1, b1, w2, b2))
    assert out.shape == (B, OUT_DIM)
    assert jnp.allclose(out, ref_fn(x), **TOL), "mismatch vs reference"

    # Ragged batch (B not a multiple of 8): exercises the partial-last-block path (no jnp.pad).
    B2 = 10
    x2 = jax.random.normal(kx2, (B2, IN_DIM), jnp.float32)
    out2 = jax.block_until_ready(distil_model(x2, w1, b1, w2, b2))
    assert out2.shape == (B2, OUT_DIM)
    assert jnp.allclose(out2, ref_fn(x2), **TOL), "mismatch vs reference (ragged)"

    # Multi-step grid with a ragged last tile (tm=8 -> 3 grid steps for B=20).
    B3 = 20
    x3 = jax.random.normal(kx3, (B3, IN_DIM), jnp.float32)
    out3 = jax.block_until_ready(distil_model(x3, w1, b1, w2, b2, tm=8))
    assert out3.shape == (B3, OUT_DIM)
    assert jnp.allclose(out3, ref_fn(x3), **TOL), "mismatch vs reference (multi-tile)"

    print("KERNEL_OK")
</pallas_src>

<mosaic_0001>
module attributes {stable_mosaic.version = 11 : i64} {
  func.func @_distil_kernel(%arg0: i32, %arg1: memref<8x768xf32, #tpu.memory_space<vmem>>, %arg2: memref<768x64xbf16, #tpu.memory_space<vmem>>, %arg3: memref<1x64xf32, #tpu.memory_space<vmem>>, %arg4: memref<64x2xbf16, #tpu.memory_space<vmem>>, %arg5: memref<1x2xf32, #tpu.memory_space<vmem>>, %arg6: memref<8x2xf32, #tpu.memory_space<vmem>>) attributes {dimension_semantics = [#tpu.dimension_semantics<parallel>], iteration_bounds = array<i64: 1>, scalar_prefetch = 0 : i64, scratch_operands = 0 : i64, tpu.core_type = #tpu.core_type<tc>, window_params = [{transform_indices = @transform_0, window_bounds = array<i64: 8, 768>}, {pipeline_mode = #tpu.pipeline_mode<synchronous>, transform_indices = @transform_1, window_bounds = array<i64: 768, 64>}, {pipeline_mode = #tpu.pipeline_mode<synchronous>, transform_indices = @transform_2, window_bounds = array<i64: 1, 64>}, {pipeline_mode = #tpu.pipeline_mode<synchronous>, transform_indices = @transform_3, window_bounds = array<i64: 64, 2>}, {pipeline_mode = #tpu.pipeline_mode<synchronous>, transform_indices = @transform_4, window_bounds = array<i64: 1, 2>}, {transform_indices = @transform_5, window_bounds = array<i64: 8, 2>}]} {
    %c0 = arith.constant 0 : index
    %c0_0 = arith.constant 0 : index
    %0 = vector.load %arg1[%c0, %c0_0] : memref<8x768xf32, #tpu.memory_space<vmem>>, vector<8x768xf32>
    %1 = arith.truncf %0 : vector<8x768xf32> to vector<8x768xbf16>
    %c0_1 = arith.constant 0 : index
    %c0_2 = arith.constant 0 : index
    %2 = vector.load %arg2[%c0_1, %c0_2] : memref<768x64xbf16, #tpu.memory_space<vmem>>, vector<768x64xbf16>
    %cst = arith.constant dense<0.000000e+00> : vector<8x64xf32>
    %3 = tpu.matmul %1, %2, %cst {dimension_numbers = #tpu.dot_dimension_numbers<[1], [0], [0], [1], [0, 0, 1, 1], [], []>} : vector<8x768xbf16>, vector<768x64xbf16>, vector<8x64xf32> -> vector<8x64xf32>
    %c0_3 = arith.constant 0 : index
    %c0_4 = arith.constant 0 : index
    %4 = vector.load %arg3[%c0_3, %c0_4] : memref<1x64xf32, #tpu.memory_space<vmem>>, vector<1x64xf32>
    %5 = vector.broadcast %4 : vector<1x64xf32> to vector<8x64xf32>
    %6 = arith.addf %3, %5 : vector<8x64xf32>
    %cst_5 = arith.constant 0.000000e+00 : f32
    %7 = vector.broadcast %cst_5 : f32 to vector<8x64xf32>
    %8 = arith.maximumf %6, %7 : vector<8x64xf32>
    %9 = arith.truncf %8 : vector<8x64xf32> to vector<8x64xbf16>
    %c0_6 = arith.constant 0 : index
    %c0_7 = arith.constant 0 : index
    %10 = vector.load %arg4[%c0_6, %c0_7] : memref<64x2xbf16, #tpu.memory_space<vmem>>, vector<64x2xbf16>
    %cst_8 = arith.constant dense<0.000000e+00> : vector<8x2xf32>
    %11 = tpu.matmul %9, %10, %cst_8 {dimension_numbers = #tpu.dot_dimension_numbers<[1], [0], [0], [1], [0, 0, 1, 1], [], []>} : vector<8x64xbf16>, vector<64x2xbf16>, vector<8x2xf32> -> vector<8x2xf32>
    %c0_9 = arith.constant 0 : index
    %c0_10 = arith.constant 0 : index
    %12 = vector.load %arg5[%c0_9, %c0_10] : memref<1x2xf32, #tpu.memory_space<vmem>>, vector<1x2xf32>
    %13 = vector.broadcast %12 : vector<1x2xf32> to vector<8x2xf32>
    %14 = arith.addf %11, %13 : vector<8x2xf32>
    %c0_11 = arith.constant 0 : index
    %c0_12 = arith.constant 0 : index
    %15 = vector.load %arg6[%c0_11, %c0_12] : memref<8x2xf32, #tpu.memory_space<vmem>>, vector<8x2xf32>
    tpu.vector_store %arg6[%c0_11, %c0_12], %14 {strides = array<i32>} : memref<8x2xf32, #tpu.memory_space<vmem>>, vector<8x2xf32>,
    return
  }
  func.func @transform_0(%arg0: i32) -> (i32, i32) {
    %c0_i32 = arith.constant 0 : i32
    %c0_i32_0 = arith.constant 0 : i32
    return %arg0, %c0_i32 : i32, i32
  }
  func.func @transform_1(%arg0: i32) -> (i32, i32) {
    %c0_i32 = arith.constant 0 : i32
    %c0_i32_0 = arith.constant 0 : i32
    %c0_i32_1 = arith.constant 0 : i32
    return %c0_i32, %c0_i32_0 : i32, i32
  }
  func.func @transform_2(%arg0: i32) -> (i32, i32) {
    %c0_i32 = arith.constant 0 : i32
    %c0_i32_0 = arith.constant 0 : i32
    %c0_i32_1 = arith.constant 0 : i32
    return %c0_i32, %c0_i32_0 : i32, i32
  }
  func.func @transform_3(%arg0: i32) -> (i32, i32) {
    %c0_i32 = arith.constant 0 : i32
    %c0_i32_0 = arith.constant 0 : i32
    %c0_i32_1 = arith.constant 0 : i32
    return %c0_i32, %c0_i32_0 : i32, i32
  }
  func.func @transform_4(%arg0: i32) -> (i32, i32) {
    %c0_i32 = arith.constant 0 : i32
    %c0_i32_0 = arith.constant 0 : i32
    %c0_i32_1 = arith.constant 0 : i32
    return %c0_i32, %c0_i32_0 : i32, i32
  }
  func.func @transform_5(%arg0: i32) -> (i32, i32) {
    %c0_i32 = arith.constant 0 : i32
    %c0_i32_0 = arith.constant 0 : i32
    return %arg0, %c0_i32 : i32, i32
  }
}

</mosaic_0001>

<bundles_post_ra>
// kernel: distil_model.1
= control target key start
LH: loop header
LB: loop body
LE: loop exit
PB: predicated region body
PF: predicated region fallthrough
CT: control target
= control target key end

     0   :  { %v827_v60 = vmov 0.0   ;;  %vm828_vm0 = vmmov 0   ;;  %vm585_vm1 = vcmask 523264   ;;  %vm629_vm2 = vcmask 15360   ;;  %s1042_s1 = inlined_call_operand.vmem [shape: bf16[768,64], index: 1, kind: input, shape index: {}]   ;;  %s1043_s0 = inlined_call_operand.vmem [shape: f32[8,768], index: 0, kind: input, shape index: {}]   ;;  %s1044_s3 = inlined_call_operand.vmem [shape: bf16[64,2], index: 3, kind: input, shape index: {}]   ;;  %s1045_s2 = inlined_call_operand.vmem [shape: f32[1,64], index: 2, kind: input, shape index: {}]   ;;  %s1046_s4 = inlined_call_operand.vmem [shape: f32[1,2], index: 4, kind: input, shape index: {}]   ;;  %s1047_s5 = inlined_call_operand.vmem [shape: f32[8,2], index: 5, kind: output, shape index: {}]  }
   0x1   :  { %v775_v0 = vld [vmem:[%s1042_s1 + $0x78] sm:$0xff]   ;;  %v779_v4 = vld [vmem:[%s1042_s1 + $0x70] sm:$0xff]   ;;  %v783_v8 = vld [vmem:[%s1042_s1 + $0x68] sm:$0xff]  }
   0x2   :  { %v776_v1 = vld [vmem:[%s1042_s1 + $0x38] sm:$0xff]   ;;  %690 = vmatprep.subr.bf16.mxu0 %v775_v0  ;;  %v780_v5 = vld [vmem:[%s1042_s1 + $0x30] sm:$0xff]   ;;  %v784_v9 = vld [vmem:[%s1042_s1 + $0x28] sm:$0xff]  }
   0x3   :  { %v777_v2 = vld [vmem:[%s1042_s1 + $0xf8] sm:$0xff]   ;;  %691 = vmatpush3.bf16.msra.mxu0 %v776_v1  ;;  %v781_v6 = vld [vmem:[%s1042_s1 + $0xf0] sm:$0xff]   ;;  %v785_v10 = vld [vmem:[%s1042_s1 + $0xe8] sm:$0xff]  }
   0x4   :  { %v778_v3 = vld [vmem:[%s1042_s1 + $0xb8] sm:$0xff]   ;;  %712 = vmatprep.subr.bf16.mxu1 %v777_v2  ;;  %692 = vmatprep.subr.bf16.mxu0 %v779_v4  ;;  %v782_v7 = vld [vmem:[%s1042_s1 + $0xb0] sm:$0xff]   ;;  %v786_v11 = vld [vmem:[%s1042_s1 + $0xa8] sm:$0xff]  }
   0x5   :  { %713 = vmatpush3.bf16.msra.mxu1 %v778_v3  ;;  %v787_v12 = vld [vmem:[%s1042_s1 + $0x60] sm:$0xff]   ;;  %v791_v16 = vld [vmem:[%s1042_s1 + $0x58] sm:$0xff]   ;;  %v795_v20 = vld [vmem:[%s1042_s1 + $0x50] sm:$0xff]  }
   0x6   :  { %714 = vmatprep.subr.bf16.mxu1 %v781_v6  ;;  %v788_v13 = vld [vmem:[%s1042_s1 + $0x20] sm:$0xff]   ;;  %v792_v17 = vld [vmem:[%s1042_s1 + $0x18] sm:$0xff]   ;;  %v796_v21 = vld [vmem:[%s1042_s1 + $0x10] sm:$0xff]  }
   0x7   :  { %693 = vmatpush3.bf16.msra.mxu0 %v780_v5  ;;  %v789_v14 = vld [vmem:[%s1042_s1 + $0xe0] sm:$0xff]   ;;  %v793_v18 = vld [vmem:[%s1042_s1 + $0xd8] sm:$0xff]   ;;  %v797_v22 = vld [vmem:[%s1042_s1 + $0xd0] sm:$0xff]  }
   0x8   :  { %694 = vmatprep.subr.bf16.mxu0 %v783_v8  ;;  %v790_v15 = vld [vmem:[%s1042_s1 + $0xa0] sm:$0xff]   ;;  %v794_v19 = vld [vmem:[%s1042_s1 + $0x98] sm:$0xff]   ;;  %v798_v23 = vld [vmem:[%s1042_s1 + $0x90] sm:$0xff]  }
   0x9   :  { %715 = vmatpush3.bf16.msra.mxu1 %v782_v7  ;;  %v799_v24 = vld [vmem:[%s1042_s1 + $0x48] sm:$0xff]   ;;  %v803_v28 = vld [vmem:[%s1042_s1 + $0x40] sm:$0xff]   ;;  %v807_v36 = vld [vmem:[%s1042_s1 + $0x178] sm:$0xff]  }
   0xa   :  { %716 = vmatprep.subr.bf16.mxu1 %v785_v10  ;;  %v800_v25 = vld [vmem:[%s1042_s1 + $0x8] sm:$0xff]   ;;  %v804_v29 = vld [vmem:[%s1042_s1] sm:$0xff]   ;;  %v24_v37 = vld [vmem:[%s1043_s0 + $0x18] sm:$0xff] }
   0xb   :  { %695 = vmatpush3.bf16.msra.mxu0 %v784_v9  ;;  %v801_v26 = vld [vmem:[%s1042_s1 + $0xc8] sm:$0xff]   ;;  %v805_v30 = vld [vmem:[%s1042_s1 + $0xc0] sm:$0xff]   ;;  %v30_v38 = vpack.c.bf16 %v24_v37, %v24_v37  ;;  %v808_v39 = vld [vmem:[%s1042_s1 + $0x138] sm:$0xff]  }
   0xc   :  { %696 = vmatprep.subr.bf16.mxu0 %v787_v12  ;;  %v802_v27 = vld [vmem:[%s1042_s1 + $0x88] sm:$0xff]   ;;  %v806_v33 = vld [vmem:[%s1042_s1 + $0x80] sm:$0xff]   ;;  %v23_v40 = vld [vmem:[%s1043_s0 + $0x10] sm:$0xff] }
   0xd   :  { %717 = vmatpush3.bf16.msra.mxu1 %v786_v11  ;;  %v22_v31 = vld [vmem:[%s1043_s0 + $0x8] sm:$0xff]  ;;  %v21_v34 = vld [vmem:[%s1043_s0] sm:$0xff]  ;;  %496 = vmatprep.mubr.bf16.mxu1 %v30_v38  ;;  %v29_v41 = vpack.c.bf16 %v23_v40, %v23_v40  ;;  %v809_v42 = vld [vmem:[%s1042_s1 + $0x170] sm:$0xff]  }
   0xe   :  { %718 = vmatprep.subr.bf16.mxu1 %v789_v14  ;;  %v28_v32 = vpack.c.bf16 %v22_v31, %v22_v31  ;;  %v27_v35 = vpack.c.bf16 %v21_v34, %v21_v34  ;;  %v810_v43 = vld [vmem:[%s1042_s1 + $0x130] sm:$0xff]   ;;  %v811_v44 = vld [vmem:[%s1042_s1 + $0x168] sm:$0xff]   ;;  %v813_v46 = vld [vmem:[%s1042_s1 + $0x160] sm:$0xff]  }
   0xf   :  { %697 = vmatpush3.bf16.msra.mxu0 %v788_v13  ;;  %v812_v45 = vld [vmem:[%s1042_s1 + $0x128] sm:$0xff]   ;;  %v814_v47 = vld [vmem:[%s1042_s1 + $0x120] sm:$0xff]   ;;  %v815_v48 = vld [vmem:[%s1042_s1 + $0x158] sm:$0xff]  }
  0x10   :  { %698 = vmatprep.subr.bf16.mxu0 %v791_v16  ;;  %456 = vmatprep.mubr.bf16.mxu0 %v28_v32  ;;  %v816_v49 = vld [vmem:[%s1042_s1 + $0x118] sm:$0xff]   ;;  %v817_v50 = vld [vmem:[%s1042_s1 + $0x150] sm:$0xff]   ;;  %v26_v51 = vld [vmem:[%s1043_s0 + $0x28] sm:$0xff] }
  0x11   :  { %719 = vmatpush3.bf16.msra.mxu1 %v790_v15  ;;  %v32_v52 = vpack.c.bf16 %v26_v51, %v26_v51  ;;  %v818_v53 = vld [vmem:[%s1042_s1 + $0x110] sm:$0xff]   ;;  %v819_v54 = vld [vmem:[%s1042_s1 + $0x148] sm:$0xff]   ;;  %v821_v56 = vld [vmem:[%s1042_s1 + $0x140] sm:$0xff]  }
  0x12   :  { %720 = vmatprep.subr.bf16.mxu1 %v793_v18  ;;  %v820_v55 = vld [vmem:[%s1042_s1 + $0x108] sm:$0xff]   ;;  %v822_v57 = vld [vmem:[%s1042_s1 + $0x100] sm:$0xff]   ;;  %v823_v61 = vld [vmem:[%s1044_s3 + $0x18] sm:$0xff]  }
  0x13   :  { %699 = vmatpush3.bf16.msra.mxu0 %v792_v17  ;;  %v25_v58 = vld [vmem:[%s1043_s0 + $0x20] sm:$0xff]  ;;  %v824_v62 = vld [vmem:[%s1044_s3 + $0x10] sm:$0xff]   ;;  %v825_v63 = vld [vmem:[%s1044_s3 + $0x8] sm:$0xff]  }
  0x14   :  { %700 = vmatprep.subr.bf16.mxu0 %v795_v20  ;;  %v31_v59 = vpack.c.bf16 %v25_v58, %v25_v58  ;;  %v826_v0 = vld [vmem:[%s1044_s3] sm:$0xff]  }
  0x15   :  { %721 = vmatpush3.bf16.msra.mxu1 %v794_v19  ;;  %v635_v10 = vld [vmem:[%s1045_s2] ss:$0 sm:$0xff] }
  0x16   :  { %722 = vmatprep.subr.bf16.mxu1 %v797_v22  ;;  %v684_v22 = vld [vmem:[%s1046_s4] ss:$0 sm:$0xff] }
  0x17   :  { %701 = vmatpush3.bf16.msra.mxu0 %v796_v21 }
  0x18   :  { %702 = vmatprep.subr.bf16.mxu0 %v799_v24 }
  0x19   :  { %723 = vmatpush3.bf16.msra.mxu1 %v798_v23 }
  0x1a   :  { %724 = vmatprep.subr.bf16.mxu1 %v801_v26 }
  0x1b   :  { %703 = vmatpush3.bf16.msra.mxu0 %v800_v25 }
  0x1c   :  { %704 = vmatprep.subr.bf16.mxu0 %v803_v28 }
  0x1d   :  { %725 = vmatpush3.bf16.msra.mxu1 %v802_v27 }
  0x1e   :  { %726 = vmatprep.subr.bf16.mxu1 %v805_v30 }
  0x1f   :  { %705 = vmatpush3.bf16.msra.mxu0 %v804_v29 }
  0x20   :  { %734 = vmatprep.subr.bf16.mxu0 %v807_v36 }
  0x21   :  { %727 = vmatpush3.bf16.msra.mxu1 %v806_v33 }
  0x22   :  { %457 = vmatmul.mubr.bf16.vlgmr.msra.gmra.mxu0 %v27_v35  ;;  %761 = vmatprep.subr.bf16.mxu1 %v827_v60 }
  0x23   :  { %735 = vmatpush3.bf16.msra.mxu0 %v808_v39  ;;  %536 = vmatprep.mubr.bf16.mxu0 %v32_v52 }
  0x24   :  { %497 = vmatmul.mubr.bf16.vlgmr.msra.gmra.mxu1 %v29_v41  ;;  %736 = vmatprep.subr.bf16.mxu0 %v809_v42 }
  0x25   :  { %762 = vmatpush3.bf16.msra.mxu1 %v823_v61  ;;  %769 = vmatprep.mubr.msk.bf16.mxu1 %vm828_vm0, %v827_v60 }
  0x26   :  { %763 = vmatprep.subr.bf16.mxu1 %v827_v60 }
  0x27   :  { %737 = vmatpush3.bf16.msra.mxu0 %v810_v43 }
  0x28   :  { %738 = vmatprep.subr.bf16.mxu0 %v811_v44 }
  0x29   :  { %764 = vmatpush3.bf16.msra.mxu1 %v824_v62 }
  0x2a   :  { %765 = vmatprep.subr.bf16.mxu1 %v827_v60 }
  0x2b   :  { %739 = vmatpush3.bf16.msra.mxu0 %v812_v45 }
  0x2c   :  { %740 = vmatprep.subr.bf16.mxu0 %v813_v46 }
  0x2d   :  { %766 = vmatpush3.bf16.msra.mxu1 %v825_v63 }
  0x2e   :  { %767 = vmatprep.subr.bf16.mxu1 %v827_v60 }
  0x2f   :  { %741 = vmatpush3.bf16.msra.mxu0 %v814_v47 }
  0x30   :  { %742 = vmatprep.subr.bf16.mxu0 %v815_v48 }
  0x31   :  { %768 = vmatpush3.bf16.msra.mxu1 %v826_v0 }
  0x33   :  { %743 = vmatpush3.bf16.msra.mxu0 %v816_v49 }
  0x34   :  { %744 = vmatprep.subr.bf16.mxu0 %v817_v50 }
  0x37   :  { %745 = vmatpush3.bf16.msra.mxu0 %v818_v53 }
  0x38   :  { %746 = vmatprep.subr.bf16.mxu0 %v819_v54 }
  0x3b   :  { %747 = vmatpush3.bf16.msra.mxu0 %v820_v55 }
  0x3c   :  { %748 = vmatprep.subr.bf16.mxu0 %v821_v56 }
  0x3f   :  { %749 = vmatpush3.bf16.msra.mxu0 %v822_v57 }
  0x42   :  { %537 = vmatmul.mubr.bf16.vlgmr.msra.gmra.mxu0 %v31_v59 }
  0xe2   :  { %v706_v1 = vpop.f32.mrf.mxu0 }
  0xe4   :  { %v707_v2 = vpop.f32.mrf.mxu0  ;;  %v728_v3 = vpop.f32.mrf.mxu1 }
  0xe5   :  { %v708_v9 = vadd.f32 %v707_v2, %v706_v1 }
  0xe6   :  { %v709_v4 = vpop.f32.mrf.mxu0  ;;  %v729_v5 = vpop.f32.mrf.mxu1 }
  0xe7   :  { %v459_v11 = vadd.f32 %v708_v9, %v635_v10  ;;  %v730_v12 = vadd.f32 %v729_v5, %v728_v3 }
  0xe8   :  { %v710_v6 = vpop.f32.mrf.mxu0  ;;  %v731_v7 = vpop.f32.mrf.mxu1 }
  0xe9   :  { %v499_v15 = vadd.f32 %v730_v12, %v459_v11 }
  0xea   :  { %v732_v8 = vpop.f32.mrf.mxu1 }
 0x102   :  { %v750_v13 = vpop.f32.mrf.mxu0 }
 0x104   :  { %v751_v14 = vpop.f32.mrf.mxu0 }
 0x105   :  { %v752_v16 = vadd.f32 %v751_v14, %v750_v13 }
 0x106   :  { %v753_v17 = vpop.f32.mrf.mxu0 }
 0x107   :  { %v539_v18 = vadd.f32 %v752_v16, %v499_v15 }
 0x108   :  { %v754_v19 = vpop.f32.mrf.mxu0 }
 0x109   :  { %v544_v20 = vmax.f32 %v539_v18, 0.0 }
 0x10b   :  { %v545_v21 = vpack.c.bf16 %v544_v20, %v544_v20 }
 0x10d   :  { %770 = vmatmul.mubr.msk.bf16.vlgmr.msra.gmra.mxu1 %vm585_vm1, %v545_v21 }
 0x1cd   :  { %v623_v23 = vpop.f32.mrf.mxu1 }
 0x1ce   :  { %v624_v24 = vadd.f32 %v684_v22, %v623_v23 }
 0x1cf   :  { %v771_v25 = vpop.f32.mrf.mxu1 }
 0x1d0   :  { %630 = vst.msk [vmem:[%s1047_s5] sm:$0xff] %vm629_vm2, %v624_v24 }
 0x1d1   :  { %v626_v26 = vpop.f32.mrf.mxu1 }
 0x1d3   :  { %v772_v27 = vpop.f32.mrf.mxu1 }

</bundles_post_ra>
